<compile_context>
chip_gen: v5e
topology: v5e:2x2
jax: 0.10.0
libtpu: 0.0.40
codegen_flags: <defaults>
</compile_context>

<pallas_src>
import functools

import jax
import jax.numpy as jnp
from jax import lax
from jax.experimental import pallas as pl
from jax.experimental.pallas import tpu as pltpu

LANES = 128
SUB = 8                  # sublanes; row count is always padded to a multiple of 8
MAX_ROW_TILE = 4096      # (4096, 128) f32 block = 2 MiB per input per pipeline buf
CHUNK_ROWS = 512         # inner fold chunk -> temporaries bounded to ~256 KiB each


def _num_tensorcores():
    """Best-effort TensorCore count (2 on v7x, 1 on v5e/v6e). Safe fallback: 1."""
    try:
        info = pltpu.get_tpu_info()
    except Exception:
        return 1
    for attr in ("tensorcore_count", "num_tensorcores", "num_cores",
                 "cores_per_chip", "core_count"):
        v = getattr(info, attr, None)
        if v is None:
            continue
        try:
            v = int(v)
        except Exception:
            continue
        if v >= 1:
            return v
    return 1


def _nse_partial_kernel(p_ref, t_ref, out_ref, *, rows, row_tile, chunk,
                        n_chunks, blocks_per_slice, mask_possible):
    j = pl.program_id(1)

    @pl.when(j == 0)
    def _():
        out_ref[...] = jnp.zeros_like(out_ref)

    blk = pl.program_id(0) * blocks_per_slice + j   # logical block index

    def tile_sums(pc, tc, row_offset, masked):
        d = tc - pc
        if masked:
            # Row-only compare: lane padding is already zero, only out-of-range
            # rows (partial tail block / clamped duplicate block) are dropped.
            # jnp.where (select) so OOB garbage (NaN/Inf) cannot poison the sum.
            row = lax.broadcasted_iota(jnp.int32, pc.shape, 0)
            keep = (row_offset + row) < rows
            d = jnp.where(keep, d, 0.0)
            tc = jnp.where(keep, tc, 0.0)

        def fold(x):
            # (chunk, 128) -> (8, 128) with pure vreg-wise VPU adds.
            return jnp.sum(x.reshape(x.shape[0] // SUB, SUB, LANES), axis=0)

        return fold(d * d), fold(tc), fold(tc * tc)

    def run(masked):
        if n_chunks == 1:
            pc = p_ref[...].astype(jnp.float32)
            tc = t_ref[...].astype(jnp.float32)
            s1, s2, s3 = tile_sums(pc, tc, blk * row_tile, masked)
        else:
            def body(c, carry):
                a1, a2, a3 = carry
                start = c * chunk
                if not isinstance(start, int):
                    start = pl.multiple_of(start, chunk)
                pc = p_ref[pl.ds(start, chunk), :].astype(jnp.float32)
                tc = t_ref[pl.ds(start, chunk), :].astype(jnp.float32)
                s1, s2, s3 = tile_sums(pc, tc, blk * row_tile + c * chunk, masked)
                return (a1 + s1, a2 + s2, a3 + s3)

            zero = jnp.zeros((SUB, LANES), jnp.float32)
            s1, s2, s3 = lax.fori_loop(0, n_chunks, body, (zero, zero, zero),
                                       unroll=True)

        out_ref[0] += s1   # S1 partials
        out_ref[1] += s2   # S2 partials
        out_ref[2] += s3   # S3 partials

    if mask_possible:
        # Only blocks that can reach past the real row count pay the mask cost.
        needs_mask = (blk + 1) * row_tile > rows

        @pl.when(jnp.logical_not(needs_mask))
        def _():
            run(False)

        @pl.when(needs_mask)
        def _():
            run(True)
    else:
        run(False)


def nse_loss(predictions, targets, *, epsilon=1e-6):
    """Nash-Sutcliffe Efficiency loss (1 - NSE), single-pass Pallas TPU kernel."""
    assert predictions.shape == targets.shape
    n_elems = int(predictions.size)
    itemsize = predictions.dtype.itemsize

    p_flat = predictions.reshape(-1)
    t_flat = targets.reshape(-1)

    # Pad to a multiple of one (8, 128) vreg tile (<= 1023 zero elements).
    # Zeros in both p and t contribute 0 to every partial sum.
    tile_elems = SUB * LANES
    rem = n_elems % tile_elems
    if rem:
        pad = tile_elems - rem
        p_flat = jnp.pad(p_flat, (0, pad))
        t_flat = jnp.pad(t_flat, (0, pad))
    rows = p_flat.shape[0] // LANES            # always a multiple of 8

    p2d = p_flat.reshape(rows, LANES)
    t2d = t_flat.reshape(rows, LANES)

    row_tile = min(rows, MAX_ROW_TILE)
    total_blocks = pl.cdiv(rows, row_tile)

    # 2-way "parallel" slice axis only when the chip has >1 TensorCore (v7x);
    # on 1-TC chips it would only create clamped duplicate blocks.
    num_slices = max(1, min(2, _num_tensorcores(), total_blocks))
    blocks_per_slice = pl.cdiv(total_blocks, num_slices)

    need_clamp = num_slices * blocks_per_slice > total_blocks
    mask_possible = num_slices * blocks_per_slice * row_tile != rows

    if row_tile > CHUNK_ROWS and row_tile % CHUNK_ROWS == 0:
        chunk = CHUNK_ROWS
    else:
        chunk = row_tile
    n_chunks = row_tile // chunk

    if need_clamp:
        def in_map(c, j):
            return (jnp.minimum(c * blocks_per_slice + j, total_blocks - 1), 0)
    else:
        def in_map(c, j):
            return (c * blocks_per_slice + j, 0)

    kernel = functools.partial(
        _nse_partial_kernel, rows=rows, row_tile=row_tile, chunk=chunk,
        n_chunks=n_chunks, blocks_per_slice=blocks_per_slice,
        mask_possible=mask_possible)

    # 2 inputs x 2 pipeline buffers of (row_tile, 128) native-dtype, plus slack
    # for chunk temporaries; stays within every chip's scoped-VMEM budget.
    buf_bytes = 2 * 2 * row_tile * LANES * itemsize
    vmem_limit = int(min(max(2 * buf_bytes + (8 << 20), 16 << 20), 30 << 20))

    part = pl.pallas_call(
        kernel,
        out_shape=jax.ShapeDtypeStruct((num_slices * 3, SUB, LANES), jnp.float32),
        grid_spec=pltpu.PrefetchScalarGridSpec(
            num_scalar_prefetch=0,
            grid=(num_slices, blocks_per_slice),
            in_specs=[
                pl.BlockSpec((row_tile, LANES), in_map),
                pl.BlockSpec((row_tile, LANES), in_map),
            ],
            out_specs=pl.BlockSpec((3, SUB, LANES), lambda c, j: (c, 0, 0)),
        ),
        compiler_params=pltpu.CompilerParams(
            dimension_semantics=("parallel", "arbitrary"),
            vmem_limit_bytes=vmem_limit),
        cost_estimate=pl.CostEstimate(
            flops=6 * n_elems, transcendentals=0,
            bytes_accessed=2 * n_elems * itemsize),
    )(p2d, t2d)

    # Tiny finalize on 3 scalars (same math as the torch module).
    sums = part.reshape(num_slices, 3, SUB * LANES).sum(axis=(0, 2))
    s1, s2, s3 = sums[0], sums[1], sums[2]
    # sum((t-mean)^2) = S3 - mean*S2; keep 1/N exact at trace time.
    # NOTE: single-pass variance loses precision if |mean(t)| >> std(t) at huge N.
    inv_n = jnp.float32(1.0 / float(n_elems))
    denominator = s3 - (s2 * inv_n) * s2
    return s1 / (denominator + jnp.float32(epsilon))


def _reference_nse_loss(predictions, targets, epsilon=1e-6):
    numerator = jnp.sum((targets - predictions) ** 2)
    denominator = jnp.sum((targets - jnp.mean(targets)) ** 2)
    nse = 1.0 - numerator / (denominator + epsilon)
    return 1.0 - nse


if __name__ == "__main__":
    key = jax.random.PRNGKey(0)
    kp, kt = jax.random.split(key)

    # NCHW inputs [2, 4, 16, 16] (small: single block, fast unmasked path).
    shape = (2, 4, 16, 16)
    predictions = jax.random.normal(kp, shape, dtype=jnp.float32)
    targets = jax.random.normal(kt, shape, dtype=jnp.float32) * 0.5 + 0.3

    loss = nse_loss(predictions, targets)
    jax.block_until_ready(loss)
    ref = _reference_nse_loss(predictions, targets)
    assert jnp.allclose(loss, ref, rtol=1e-4, atol=1e-5), (loss, ref)

    # Odd-sized input that exercises the multi-block pipeline and the gated
    # tail-block mask path (partial last row-block).
    kp2, kt2 = jax.random.split(kt)
    shape2 = (8, 4, 130, 131)
    predictions2 = jax.random.normal(kp2, shape2, dtype=jnp.float32)
    targets2 = jax.random.normal(kt2, shape2, dtype=jnp.float32) * 0.5 + 0.3

    loss2 = nse_loss(predictions2, targets2)
    jax.block_until_ready(loss2)
    ref2 = _reference_nse_loss(predictions2, targets2)
    assert jnp.allclose(loss2, ref2, rtol=2e-3, atol=1e-3), (loss2, ref2)

    print("KERNEL_OK")
</pallas_src>

<mosaic_0001>
module attributes {stable_mosaic.version = 11 : i64} {
  func.func @_nse_partial_kernel(%arg0: i32, %arg1: i32, %arg2: memref<16x128xf32, #tpu.memory_space<vmem>>, %arg3: memref<16x128xf32, #tpu.memory_space<vmem>>, %arg4: memref<3x8x128xf32, #tpu.memory_space<vmem>>) attributes {dimension_semantics = [#tpu.dimension_semantics<parallel>, #tpu.dimension_semantics<arbitrary>], iteration_bounds = array<i64: 1, 1>, scalar_prefetch = 0 : i64, scratch_operands = 0 : i64, tpu.core_type = #tpu.core_type<tc>, window_params = [{transform_indices = @transform_0, window_bounds = array<i64: 16, 128>}, {transform_indices = @transform_1, window_bounds = array<i64: 16, 128>}, {transform_indices = @transform_2, window_bounds = array<i64: 3, 8, 128>}]} {
    %c0_i32 = arith.constant 0 : i32
    %0 = arith.cmpi eq, %arg1, %c0_i32 : i32
    %1 = arith.extui %0 : i1 to i32
    %c0_i32_0 = arith.constant 0 : i32
    %2 = arith.cmpi ne, %1, %c0_i32_0 : i32
    scf.if %2 {
      %cst_22 = arith.constant 0.000000e+00 : f32
      %32 = vector.broadcast %cst_22 : f32 to vector<3x8x128xf32>
      %c0_23 = arith.constant 0 : index
      %c0_24 = arith.constant 0 : index
      %c0_25 = arith.constant 0 : index
      %33 = vector.load %arg4[%c0_23, %c0_24, %c0_25] : memref<3x8x128xf32, #tpu.memory_space<vmem>>, vector<3x8x128xf32>
      tpu.vector_store %arg4[%c0_23, %c0_24, %c0_25], %32 {strides = array<i32>} : memref<3x8x128xf32, #tpu.memory_space<vmem>>, vector<3x8x128xf32>,
    } else {
    }
    %c0 = arith.constant 0 : index
    %c0_1 = arith.constant 0 : index
    %3 = vector.load %arg2[%c0, %c0_1] : memref<16x128xf32, #tpu.memory_space<vmem>>, vector<16x128xf32>
    %c0_2 = arith.constant 0 : index
    %c0_3 = arith.constant 0 : index
    %4 = vector.load %arg3[%c0_2, %c0_3] : memref<16x128xf32, #tpu.memory_space<vmem>>, vector<16x128xf32>
    %5 = arith.subf %4, %3 : vector<16x128xf32>
    %6 = arith.mulf %5, %5 : vector<16x128xf32>
    %7 = vector.shape_cast %6 : vector<16x128xf32> to vector<2x8x128xf32>
    %cst = arith.constant dense<0.000000e+00> : vector<8x128xf32>
    %8 = vector.multi_reduction <add>, %7, %cst [0] : vector<2x8x128xf32> to vector<8x128xf32>
    %9 = vector.shape_cast %4 : vector<16x128xf32> to vector<2x8x128xf32>
    %cst_4 = arith.constant dense<0.000000e+00> : vector<8x128xf32>
    %10 = vector.multi_reduction <add>, %9, %cst_4 [0] : vector<2x8x128xf32> to vector<8x128xf32>
    %11 = arith.mulf %4, %4 : vector<16x128xf32>
    %12 = vector.shape_cast %11 : vector<16x128xf32> to vector<2x8x128xf32>
    %cst_5 = arith.constant dense<0.000000e+00> : vector<8x128xf32>
    %13 = vector.multi_reduction <add>, %12, %cst_5 [0] : vector<2x8x128xf32> to vector<8x128xf32>
    %c0_6 = arith.constant 0 : index
    %c0_7 = arith.constant 0 : index
    %c0_8 = arith.constant 0 : index
    %14 = vector.load %arg4[%c0_6, %c0_7, %c0_8] : memref<3x8x128xf32, #tpu.memory_space<vmem>>, vector<1x8x128xf32>
    %15 = vector.shape_cast %14 : vector<1x8x128xf32> to vector<8x128xf32>
    %16 = arith.addf %15, %8 : vector<8x128xf32>
    %c0_9 = arith.constant 0 : index
    %c0_10 = arith.constant 0 : index
    %c0_11 = arith.constant 0 : index
    %17 = vector.load %arg4[%c0_9, %c0_10, %c0_11] : memref<3x8x128xf32, #tpu.memory_space<vmem>>, vector<1x8x128xf32>
    %18 = vector.shape_cast %17 : vector<1x8x128xf32> to vector<8x128xf32>
    %19 = vector.shape_cast %16 : vector<8x128xf32> to vector<1x8x128xf32>
    tpu.vector_store %arg4[%c0_9, %c0_10, %c0_11], %19 {strides = array<i32>} : memref<3x8x128xf32, #tpu.memory_space<vmem>>, vector<1x8x128xf32>,
    %c1 = arith.constant 1 : index
    %c0_12 = arith.constant 0 : index
    %c0_13 = arith.constant 0 : index
    %20 = vector.load %arg4[%c1, %c0_12, %c0_13] : memref<3x8x128xf32, #tpu.memory_space<vmem>>, vector<1x8x128xf32>
    %21 = vector.shape_cast %20 : vector<1x8x128xf32> to vector<8x128xf32>
    %22 = arith.addf %21, %10 : vector<8x128xf32>
    %c1_14 = arith.constant 1 : index
    %c0_15 = arith.constant 0 : index
    %c0_16 = arith.constant 0 : index
    %23 = vector.load %arg4[%c1_14, %c0_15, %c0_16] : memref<3x8x128xf32, #tpu.memory_space<vmem>>, vector<1x8x128xf32>
    %24 = vector.shape_cast %23 : vector<1x8x128xf32> to vector<8x128xf32>
    %25 = vector.shape_cast %22 : vector<8x128xf32> to vector<1x8x128xf32>
    tpu.vector_store %arg4[%c1_14, %c0_15, %c0_16], %25 {strides = array<i32>} : memref<3x8x128xf32, #tpu.memory_space<vmem>>, vector<1x8x128xf32>,
    %c2 = arith.constant 2 : index
    %c0_17 = arith.constant 0 : index
    %c0_18 = arith.constant 0 : index
    %26 = vector.load %arg4[%c2, %c0_17, %c0_18] : memref<3x8x128xf32, #tpu.memory_space<vmem>>, vector<1x8x128xf32>
    %27 = vector.shape_cast %26 : vector<1x8x128xf32> to vector<8x128xf32>
    %28 = arith.addf %27, %13 : vector<8x128xf32>
    %c2_19 = arith.constant 2 : index
    %c0_20 = arith.constant 0 : index
    %c0_21 = arith.constant 0 : index
    %29 = vector.load %arg4[%c2_19, %c0_20, %c0_21] : memref<3x8x128xf32, #tpu.memory_space<vmem>>, vector<1x8x128xf32>
    %30 = vector.shape_cast %29 : vector<1x8x128xf32> to vector<8x128xf32>
    %31 = vector.shape_cast %28 : vector<8x128xf32> to vector<1x8x128xf32>
    tpu.vector_store %arg4[%c2_19, %c0_20, %c0_21], %31 {strides = array<i32>} : memref<3x8x128xf32, #tpu.memory_space<vmem>>, vector<1x8x128xf32>,
    return
  }
  func.func @transform_0(%arg0: i32, %arg1: i32) -> (i32, i32) {
    %c1_i32 = arith.constant 1 : i32
    %0 = arith.muli %arg0, %c1_i32 : i32
    %1 = arith.addi %0, %arg1 : i32
    %c0_i32 = arith.constant 0 : i32
    %c0_i32_0 = arith.constant 0 : i32
    return %1, %c0_i32 : i32, i32
  }
  func.func @transform_1(%arg0: i32, %arg1: i32) -> (i32, i32) {
    %c1_i32 = arith.constant 1 : i32
    %0 = arith.muli %arg0, %c1_i32 : i32
    %1 = arith.addi %0, %arg1 : i32
    %c0_i32 = arith.constant 0 : i32
    %c0_i32_0 = arith.constant 0 : i32
    return %1, %c0_i32 : i32, i32
  }
  func.func @transform_2(%arg0: i32, %arg1: i32) -> (i32, i32, i32) {
    %c0_i32 = arith.constant 0 : i32
    %c0_i32_0 = arith.constant 0 : i32
    %c0_i32_1 = arith.constant 0 : i32
    return %arg0, %c0_i32, %c0_i32_0 : i32, i32, i32
  }
}

</mosaic_0001>

<bundles_post_ra>
// kernel: tpu_custom_call.1
= control target key start
LH: loop header
LB: loop body
LE: loop exit
PB: predicated region body
PF: predicated region fallthrough
CT: control target
= control target key end

     0   :  { %7 = vsyncpa [#allocation3], 0  ;;  %s229_s0 = inlined_call_operand.hbm [shape: f32[16,128], index: 0, kind: input, shape index: {}]   ;;  %s230_s1 = inlined_call_operand.hbm [shape: f32[16,128], index: 1, kind: input, shape index: {}]   ;;  %s231_s2 = inlined_call_operand.hbm [shape: f32[3,8,128], index: 2, kind: output, shape index: {}]  }
   0x1   :  { %8 = vsyncpa [#allocation6], 0 }
   0x2   :  { %9 = vsyncpa [#allocation4], 0  ;;  %s18_s11 = sshll.u32 %s229_s0, 4  ;;  %s191_s12 = smov [#allocation2]   ;;  %s19_s11 = int_to_ptr.hbm [resolvable:$true] %s18_s11 }
   0x3   :  { %s20_s13 = sshll.u32 %s191_s12, 4  ;;  %s35_s16 = sshll.u32 %s230_s1, 4  ;;  %s21_s13 = int_to_ptr.vmem [resolvable:$true] %s20_s13  ;;  %s36_s16 = int_to_ptr.hbm [resolvable:$true] %s35_s16 }
   0x4   :  { %s192_s17 = smov 128   ;;  %s193_s18 = smov 8  }
   0x5   :  { %26 = dma.hbm_to_vmem [thread:$0]  %s19_s11, 256, %s21_s13, [#allocation3], %s192_s17, %s192_s17, %s193_s18  }
   0x6   :  { %s194_s19 = smov [#allocation5]  }
   0x7   :  { %s37_s20 = sshll.u32 %s194_s19, 4  ;;  %s38_s20 = int_to_ptr.vmem [resolvable:$true] %s37_s20 }
   0x8   :  { %43 = dma.hbm_to_vmem [thread:$0]  %s36_s16, 256, %s38_s20, [#allocation6], %s192_s17, %s192_s17, %s193_s18  }
   0x9   :  { %185 = dma.done.wait [#allocation3], 256  }
   0xa   :  { %186 = vsyncadd [#allocation3], 4294967040 }
   0xb   :  { %187 = dma.done.wait [#allocation6], 256  }
   0xc   :  { %188 = vsyncadd [#allocation6], 4294967040  ;;  %v63_v0 = vld [vmem:[#allocation2] sm:$0xff]  ;;  %v64_v1 = vld [vmem:[#allocation2 + $0x8] sm:$0xff]  ;;  %s195_s0 = smov [#allocation7]   ;;  %s93_s23 = sshll.u32 %s231_s2, 4  ;;  %s94_s23 = int_to_ptr.hbm [resolvable:$true] %s93_s23 }
   0xd   :  { %v65_v2 = vld [vmem:[#allocation5] sm:$0xff]  ;;  %v66_v3 = vld [vmem:[#allocation5 + $0x8] sm:$0xff]  ;;  %s91_s1 = sshll.u32 %s195_s0, 4  ;;  %s92_s1 = int_to_ptr.vmem [resolvable:$true] %s91_s1 }
   0xe   :  { %v67_v4 = vsub.f32 %v65_v2, %v63_v0  ;;  %v73_v5 = vmul.f32 %v65_v2, %v65_v2  ;;  %v68_v6 = vsub.f32 %v66_v3, %v64_v1  ;;  %v72_v7 = vadd.f32 %v66_v3, %v65_v2 }
   0xf   :  { %v74_v8 = vmul.f32 %v66_v3, %v66_v3 }
  0x10   :  { %v69_v9 = vmul.f32 %v67_v4, %v67_v4  ;;  %v70_v10 = vmul.f32 %v68_v6, %v68_v6  ;;  %82 = vst [vmem:[#allocation7 + $0x8] sm:$0xff] %v72_v7 }
  0x11   :  { %v75_v11 = vadd.f32 %v74_v8, %v73_v5 }
  0x12   :  { %v71_v12 = vadd.f32 %v70_v10, %v69_v9 }
  0x13   :  { %86 = vst [vmem:[#allocation7 + $0x10] sm:$0xff] %v75_v11 }
  0x14   :  { %78 = vst [vmem:[#allocation7] sm:$0xff] %v71_v12 }
  0x15   :  { %99 = dma.vmem_to_hbm [thread:$0]  %s92_s1, 384, %s94_s23, [#allocation4], %s192_s17, %s192_s17, %s193_s18  }
  0x16   :  { %189 = dma.done.wait [#allocation4], 384  }
  0x17   :  { %190 = vsyncadd [#allocation4], 4294966912 }
  0x18   :  { %104 = vsyncpa [#allocation3], 1 }
  0x19   :  { %105 = vsyncpa [#allocation6], 1 }
  0x1a   :  { %106 = vsyncpa [#allocation4], 1 }

</bundles_post_ra>
